<compile_context>
chip_gen: v6e
topology: v6e:2x2x1
jax: 0.10.0
libtpu: 0.0.40
codegen_flags: <defaults>
</compile_context>

<pallas_src>
import jax
import jax.numpy as jnp
from jax.experimental import pallas as pl
from jax.experimental.pallas import tpu as pltpu


def _up_block_kernel(w_ref, x_ref, o_ref):
    """One grid point = (batch sample n, spatial lane tile l).

    w_ref : (KK*Cout, Cin)   pre-composed effective weight (tiny, resident)
    x_ref : (Cin, TL)        channel-major slab of TL spatial positions of sample n
    o_ref : (KK*Cout, TL)    all (kh, kw, cout) outputs for those positions
    """
    o_ref[...] = jnp.dot(
        w_ref[...], x_ref[...], preferred_element_type=jnp.float32
    ).astype(o_ref.dtype)


def _pick_lane_tile(hw, cap=8192):
    """Largest multiple-of-128 divisor of hw that is <= cap; else the full extent
    (a full-extent last-dim block is always a legal BlockSpec)."""
    if hw <= cap:
        return hw
    t = (cap // 128) * 128
    while t >= 128:
        if hw % t == 0:
            return t
        t -= 128
    return hw


def unest_up_block(x, w_init, w_blocks, *, max_lane_tile=8192):
    """x: (N, Cin, H, W) NCHW.  w_init: (Cin, Cout, kH, kW) ConvTranspose2d weight.
    w_blocks: (num_layer, Cout, Cout) 1x1 ConvTranspose2d weights (in-ch first)."""
    N, Cin, H, W = x.shape
    _, Cout, kH, kW = w_init.shape
    num_layer = w_blocks.shape[0]
    KK = kH * kW
    HW = H * W
    tl = _pick_lane_tile(HW, max_lane_tile)

    # --- host-side algebra (tiny): pre-compose the whole linear chain. ---
    w_chain = jnp.eye(Cout, dtype=jnp.float32)
    for l in range(num_layer):
        w_chain = w_chain @ w_blocks[l].astype(jnp.float32)
    # (kH, kW, Cout_final, Cin): rows ordered (kh, kw, cout), columns = input channels.
    w_eff = jnp.einsum('codf,oq->dfqc', w_init.astype(jnp.float32), w_chain)
    w_eff = w_eff.reshape(KK * Cout, Cin).astype(x.dtype)

    # NCHW -> (N, Cin, H*W) is a free view; no host-side transpose of the activation.
    x_r = x.reshape(N, Cin, HW)

    out = pl.pallas_call(
        _up_block_kernel,
        out_shape=jax.ShapeDtypeStruct((N, KK * Cout, HW), x.dtype),
        grid_spec=pltpu.PrefetchScalarGridSpec(
            num_scalar_prefetch=0,
            grid=(N, HW // tl),
            in_specs=[
                pl.BlockSpec((KK * Cout, Cin), lambda n, l: (0, 0)),    # resident weight
                pl.BlockSpec((None, Cin, tl), lambda n, l: (n, 0, l)),  # activation slab
            ],
            out_specs=pl.BlockSpec((None, KK * Cout, tl), lambda n, l: (n, 0, l)),
        ),
        compiler_params=pltpu.CompilerParams(
            dimension_semantics=("parallel", "parallel"),
            vmem_limit_bytes=32 * 1024 * 1024,
        ),
    )(w_eff, x_r)

    # Scatter per-offset channels back to NCHW. The kW/kH interleave cannot be written
    # as a rectangular (8,128)-aligned out BlockSpec, so one host transpose remains.
    # TODO(synk): if downstream consumers accept channels-last, drop this transpose.
    out = out.reshape(N, kH, kW, Cout, H, W)
    out = jnp.transpose(out, (0, 3, 4, 1, 5, 2)).reshape(N, Cout, H * kH, W * kW)
    return out


def _reference_forward(x, w_init, w_blocks):
    """Pure-JAX reference mirroring the PyTorch forward."""
    N, Cin, H, W = x.shape
    _, Cout, kH, kW = w_init.shape
    # ConvTranspose2d with kernel == stride, no bias.
    y = jnp.einsum('nchw,codf->nohdwf', x, w_init)            # (N,Cout,H,kH,W,kW)
    y = y.reshape(N, Cout, H * kH, W * kW)
    # num_layer x (1x1 ConvTranspose2d, no bias) == channel matmuls.
    for l in range(w_blocks.shape[0]):
        y = jnp.einsum('nchw,cd->ndhw', y, w_blocks[l])
    return y


if __name__ == "__main__":
    # Module hyper-parameters (conv_block=False, res_block=False path).
    in_channels = 4
    out_channels = 8
    num_layer = 2
    upsample_kernel_size = 2  # == upsample stride

    key = jax.random.PRNGKey(0)
    k_x, k_wi, k_wb = jax.random.split(key, 3)
    N, H, W = 2, 16, 16
    x = jax.random.normal(k_x, (N, in_channels, H, W), dtype=jnp.float32)
    # ConvTranspose2d weight layout: (in_channels, out_channels, kH, kW)
    w_init = 0.1 * jax.random.normal(
        k_wi, (in_channels, out_channels, upsample_kernel_size, upsample_kernel_size),
        dtype=jnp.float32)
    # num_layer 1x1 transposed-conv weights: (Cout_in, Cout_out) each.
    w_blocks = 0.1 * jax.random.normal(
        k_wb, (num_layer, out_channels, out_channels), dtype=jnp.float32)

    y = unest_up_block(x, w_init, w_blocks)
    y = jax.block_until_ready(y)

    y_ref = _reference_forward(x, w_init, w_blocks)
    assert y.shape == (N, out_channels, H * upsample_kernel_size, W * upsample_kernel_size)
    # Pre-composing the weight chain re-associates the f32 matmuls; keep a small slack.
    assert jnp.allclose(y, y_ref, atol=1e-5, rtol=1e-4)

    print("KERNEL_OK")
</pallas_src>

<mosaic_0001>
module attributes {stable_mosaic.version = 11 : i64} {
  func.func @_up_block_kernel(%arg0: i32, %arg1: i32, %arg2: memref<32x4xf32, #tpu.memory_space<vmem>>, %arg3: memref<1x4x256xf32, #tpu.memory_space<vmem>>, %arg4: memref<1x32x256xf32, #tpu.memory_space<vmem>>) attributes {dimension_semantics = [#tpu.dimension_semantics<parallel>, #tpu.dimension_semantics<parallel>], iteration_bounds = array<i64: 2, 1>, scalar_prefetch = 0 : i64, scratch_operands = 0 : i64, tpu.core_type = #tpu.core_type<tc>, window_params = [{pipeline_mode = #tpu.pipeline_mode<synchronous>, transform_indices = @transform_0, window_bounds = array<i64: 32, 4>}, {transform_indices = @transform_1, window_bounds = array<i64: 1, 4, 256>}, {transform_indices = @transform_2, window_bounds = array<i64: 1, 32, 256>}]} {
    %c0 = arith.constant 0 : index
    %c0_0 = arith.constant 0 : index
    %0 = vector.load %arg2[%c0, %c0_0] : memref<32x4xf32, #tpu.memory_space<vmem>>, vector<32x4xf32>
    %c0_1 = arith.constant 0 : index
    %c0_2 = arith.constant 0 : index
    %c0_3 = arith.constant 0 : index
    %1 = vector.load %arg3[%c0_1, %c0_2, %c0_3] : memref<1x4x256xf32, #tpu.memory_space<vmem>>, vector<1x4x256xf32>
    %2 = vector.shape_cast %1 : vector<1x4x256xf32> to vector<4x256xf32>
    %cst = arith.constant dense<0.000000e+00> : vector<32x256xf32>
    %3 = tpu.matmul %0, %2, %cst {dimension_numbers = #tpu.dot_dimension_numbers<[1], [0], [0], [1], [0, 0, 1, 1], [], []>} : vector<32x4xf32>, vector<4x256xf32>, vector<32x256xf32> -> vector<32x256xf32>
    %c0_4 = arith.constant 0 : index
    %c0_5 = arith.constant 0 : index
    %c0_6 = arith.constant 0 : index
    %4 = vector.load %arg4[%c0_4, %c0_5, %c0_6] : memref<1x32x256xf32, #tpu.memory_space<vmem>>, vector<1x32x256xf32>
    %5 = vector.shape_cast %4 : vector<1x32x256xf32> to vector<32x256xf32>
    %6 = vector.shape_cast %3 : vector<32x256xf32> to vector<1x32x256xf32>
    tpu.vector_store %arg4[%c0_4, %c0_5, %c0_6], %6 {strides = array<i32>} : memref<1x32x256xf32, #tpu.memory_space<vmem>>, vector<1x32x256xf32>,
    return
  }
  func.func @transform_0(%arg0: i32, %arg1: i32) -> (i32, i32) {
    %c0_i32 = arith.constant 0 : i32
    %c0_i32_0 = arith.constant 0 : i32
    %c0_i32_1 = arith.constant 0 : i32
    return %c0_i32, %c0_i32_0 : i32, i32
  }
  func.func @transform_1(%arg0: i32, %arg1: i32) -> (i32, i32, i32) {
    %c0_i32 = arith.constant 0 : i32
    %c0_i32_0 = arith.constant 0 : i32
    return %arg0, %c0_i32, %arg1 : i32, i32, i32
  }
  func.func @transform_2(%arg0: i32, %arg1: i32) -> (i32, i32, i32) {
    %c0_i32 = arith.constant 0 : i32
    %c0_i32_0 = arith.constant 0 : i32
    return %arg0, %c0_i32, %arg1 : i32, i32, i32
  }
}

</mosaic_0001>

<bundles_post_ra>
// kernel: tpu_custom_call.1
= control target key start
LH: loop header
LB: loop body
LE: loop exit
PB: predicated region body
PF: predicated region fallthrough
CT: control target
= control target key end

     0   :  { %7 = vsyncpa [#allocation3], 0  ;;  %s695_s0 = inlined_call_operand.vmem [shape: f32[32,4], index: 0, kind: input, shape index: {}]   ;;  %s696_s1 = inlined_call_operand.vmem [shape: f32[2,4,256], index: 1, kind: input, shape index: {}]   ;;  %s697_s2 = inlined_call_operand.hbm [shape: f32[2,32,256], index: 2, kind: output, shape index: {}]  }
   0x1   :  { %9 = vsyncpa [#allocation3 + $0x1], 0  ;;  %s569_s9 = smov 0   ;;  %s571_s10 = smov 0  }
   0x2   :  { %s573_s11 = smov 0   ;;  %s575_s12 = smov 0  }
   0x3   :  { %s577_s13 = smov 0   ;;  %s579_s14 = smov 0  }
   0x4 LB: > { %s390_s15 = sadd.s32 4294967295, %s548_s14   ;;  %s391_s16 = sadd.s32 4294967294, %s548_s14   ;;  %s548_s14 = sphi %s579_s14, %s15_s14   ;;  %s544_s13 = sphi %s577_s13, %s704_s13   ;;  %s540_s12 = sphi %s575_s12, %s703_s12   ;;  %s536_s11 = sphi %s573_s11, %s702_s11   ;;  %s532_s10 = sphi %s571_s10, %s701_s10   ;;  %s528_s9 = sphi %s569_s9, %s700_s9  }
   0x5   : > { %s27_s17 = sadd.s32 1, %s544_s13  ;;  %s85_s18 = sadd.s32 1, %s536_s11 }
   0x6   : > { %p29_p0 = scmp.ge.s32.totalorder %s27_s17, 2  ;;  %p95_p1 = scmp.ne.s32.totalorder %s536_s11, %s532_s10 }
   0x7   : > { %p96_p2 = scmp.eq.s32.totalorder %s390_s15, 1  ;;  %p101_p3 = scmp.ne.s32.totalorder %s532_s10, %s528_s9 }
   0x8   : > { %s706_s17 = smov (%p29_p0, %s27_s17), 0  ;;  %p102_p5 = scmp.eq.s32.totalorder %s391_s16, 1 }
   0x9   : > { %p609_p4 = por %p96_p2, %p95_p1  ;;  %s80_s20 = ssub.s32 %s544_s13, %s706_s17 }
   0xa   : > { %p394_p6 = scmp.ge.s32.totalorder %s548_s14, 1  ;;  %p83_p7 = scmp.eq.s32.totalorder %s80_s20, 0 }
   0xb   : > { %p616_p8 = por %p102_p5, %p101_p3  ;;  %p136_p9 = scmp.lt.s32.totalorder %s548_s14, 3 }
   0xc   : > { %s622_s22 = scalar_select %p83_p7, %s536_s11, %s85_s18  }
   0xd   : > { %p137_p10 = pnand %p394_p6, %p136_p9 }
   0xe   : > { %p163_p11 = scmp.lt.s32.totalorder (!%p137_p10), %s540_s12, 1  ;;  %s159_s8 = sand.u32 (!%p137_p10), 1, %s532_s10  }
   0xf   : > { %140 = sbr.rel (%p137_p10) target bundleno = 242 (0xf2), region = 28  ;;  %s395_s15 = sshll.u32 (!%p137_p10), %s159_s8, 6 }
  0x10   : > { %s161_s16 = scalar_lea.vmem (!%p137_p10), [#allocation2], %s395_s15  ;;  %s410_s20 = sshll.u32 (!%p137_p10), %s540_s12, 10 }
  0x11   : > { %s311_s18 = sshll.u32 (!%p137_p10), %s161_s16, 4  ;;  %s648_s25 = scalar_lea.hbm (!%p137_p10), %s697_s2, %s410_s20  ;;  %s643_s18 = int_to_ptr.vmem [resolvable:$true] %s311_s18 }
  0x12   : > { %s472_s26 = scalar_lea.vmem (!%p137_p10), %s643_s18, 1024 }
  0x13   : > { %p473_p12 = scmp.ne.s32.totalorder (!%p137_p10), %s643_s18, %s472_s26 }
  0x14   : > { %v550_v0 = vmov 0.0   ;;  %s164_s23 = scalar_select %p163_p11, %s540_s12, 1  ;;  %vm193_vm0 = vcmask 1043456   ;;  %v173_v3 = vld [vmem:[%s695_s0] sm:$0xff]  ;;  %vm180_vm1 = vcmask 31744   ;;  %v175_v4 = vld [vmem:[%s695_s0 + $0x10] sm:$0xff] }
  0x15   : > { %262 = vmatprep.mubr.f32.mxu0 %v550_v0  ;;  %274 = vmatprep.mubr.f32.mxu1 %v550_v0  ;;  %v174_v5 = vld [vmem:[%s695_s0 + $0x8] sm:$0xff]  ;;  %v176_v6 = vld [vmem:[%s695_s0 + $0x18] sm:$0xff]  ;;  %s650_s12 = scalar_lea.sflag [#allocation3], %s159_s8  ;;  %p474_p13 = pnand %p473_p12, %p609_p4 }
  0x16   : > { %s409_s24 = sshll.u32 %s164_s23, 3 }
  0x17   : > { %s170_s27 = scalar_lea.vmem %s696_s1, %s409_s24  ;;  %p475_p0 = pneg %p474_p13 }
  0x18   : > { %v177_v1 = vld [vmem:[%s170_s27] sm:$0xff]  ;;  %s551_s27 = smov [#allocation2]  }
  0x19   : > { %v179_v2 = vcombine.high %v177_v1, %v177_v1  ;;  %s476_s28 = sshll.u32 %s551_s27, 4  ;;  %s477_s28 = int_to_ptr.vmem [resolvable:$false] %s476_s28 }
  0x1a   : > { %s478_s29 = scalar_lea.vmem %s477_s28, 2048  ;;  %p479_p1 = scmp.lt.s32.totalorder %s643_s18, %s477_s28 }
  0x1b   : > { %398 = vmatprep.subr.msk.mxu0 %vm193_vm0, %v179_v2  ;;  %411 = vmatprep.subr.msk.mxu1 %vm193_vm0, %v179_v2  ;;  %p480_p2 = scmp.lt.s32.totalorder %s478_s29, %s472_s26 }
  0x1c   : > { %399 = vmatpush1.msk.msra.mxu0 %vm193_vm0, %v177_v1  ;;  %412 = vmatpush1.msk.msra.mxu1 %vm193_vm0, %v177_v1 }
  0x1d   : > { %400 = vmatmul.mubr.msk.f32.vlgmr.msra.gmra.mxu0 %vm180_vm1, %v173_v3  ;;  %402 = vmatmul.mubr.msk.f32.vlgmr.msra.gmra.mxu1 %vm180_vm1, %v175_v4  ;;  %p481_p3 = por %p480_p2, %p479_p1 }
  0x1e   : > { %268 = vmatprep.mubr.f32.mxu0 %v550_v0  ;;  %280 = vmatprep.mubr.f32.mxu1 %v550_v0 }
  0x1f   : > { %p482_p5 = pnand %p481_p3, %p475_p0 }
  0x21   : > { %401 = vmatmul.mubr.msk.f32.gmra.mxu0 %vm180_vm1, %v174_v5  ;;  %403 = vmatmul.mubr.msk.f32.gmra.mxu1 %vm180_vm1, %v176_v6 }
  0xdd   : > { %v264_v7 = vpop.f32.mrf.mxu0  ;;  %v276_v8 = vpop.f32.mrf.mxu1 }
  0xde   : > { %287 = vst [vmem:[%s161_s16] sm:$0xff] %v264_v7  ;;  %291 = vst [vmem:[%s161_s16 + $0x20] sm:$0xff] %v276_v8 }
  0xdf   : > { %v266_v9 = vpop.f32.mrf.mxu0  ;;  %v278_v10 = vpop.f32.mrf.mxu1 }
  0xe0   : > { %288 = vst [vmem:[%s161_s16 + $0x8] sm:$0xff] %v266_v9  ;;  %292 = vst [vmem:[%s161_s16 + $0x28] sm:$0xff] %v278_v10 }
  0xe1   : > { %v270_v11 = vpop.f32.mrf.mxu0  ;;  %v282_v12 = vpop.f32.mrf.mxu1 }
  0xe2   : > { %289 = vst [vmem:[%s161_s16 + $0x10] sm:$0xff] %v270_v11  ;;  %293 = vst [vmem:[%s161_s16 + $0x30] sm:$0xff] %v282_v12 }
  0xe3   : > { %v272_v13 = vpop.f32.mrf.mxu0  ;;  %v284_v14 = vpop.f32.mrf.mxu1 }
  0xe4   : > { %290 = vst [vmem:[%s161_s16 + $0x18] sm:$0xff] %v272_v13  ;;  %294 = vst [vmem:[%s161_s16 + $0x38] sm:$0xff] %v284_v14 }
  0xe5   : > { %485 = shalt.err (!%p482_p5)
}
  0xe6   : > { %s486_s30 = scalar_lea.hbm %s648_s25, 1024  ;;  %s490_s5 = scalar_lea.hbm %s697_s2, 2048 }
  0xe7   : > { %p487_p6 = scmp.ne.s32.totalorder %s648_s25, %s486_s30  ;;  %p491_p10 = scmp.lt.s32.totalorder %s648_s25, %s697_s2 }
  0xe8   : > { %p492_p11 = scmp.lt.s32.totalorder %s490_s5, %s486_s30 }
  0xe9   : > { %p488_p7 = pnand %p487_p6, %p609_p4 }
  0xea   : > { %p493_p12 = por %p492_p11, %p491_p10 }
  0xeb   : > { %p489_p9 = pneg %p488_p7 }
  0xed   : > { %p494_p13 = pnand %p493_p12, %p489_p9 }
  0xef   : > { %497 = shalt.err (!%p494_p13)
}
  0xf0   : > { %s552_s8 = smov 256   ;;  %s553_s15 = smov 16  }
  0xf1   : > { %413 = dma.vmem_to_hbm [thread:$0]  (%p609_p4), %s643_s18, 1024, %s648_s25, %s650_s12, %s552_s8, %s552_s8, %s553_s15  }
  0xf2 PF: > { %p419_p0 = scmp.ge.s32.totalorder %s548_s14, 2  ;;  %s326_s16 = sand.u32 1, %s528_s9  }
  0xf3   : > { %s327_s20 = scalar_lea.sflag [#allocation3], %s326_s16 }
  0xf4   : > { %p416_p1 = pnand %p419_p0, %p616_p8 }
  0xf6   : > { %p417_p2 = pneg %p416_p1 }
  0xf8   : > { %523 = dma.done.wait (%p417_p2), %s327_s20, 1024  }
  0xf9   : > { %525 = vsyncadd (%p417_p2), %s327_s20, 4294966272  ;;  %s15_s14 = sadd.s32 1, %s548_s14   ;;  %s700_s9 = smov %s532_s10 }
  0xfa   : > { %p12_p3 = scmp.ge.s32.totalorder %s15_s14, 4   ;;  %s701_s10 = smov %s536_s11 }
  0xfb   : > { %s702_s11 = smov %s622_s22  ;;  %s703_s12 = smov %s544_s13 }
  0xfc   : > { %s704_s13 = smov %s706_s17  ;;  %14 = sbr.rel (!%p12_p3) target bundleno = 4 (0x4), region = 63 }
 0x101   :  { %332 = vsyncpa [#allocation3], 1 }
 0x102   :  { %334 = vsyncpa [#allocation3 + $0x1], 1 }

</bundles_post_ra>
